<compile_context>
chip_gen: v6e
topology: v6e:2x2x1
jax: 0.10.0
libtpu: 0.0.40
codegen_flags: <defaults>
</compile_context>

<pallas_src>
import functools

import jax
import jax.numpy as jnp
import numpy as np
from jax.experimental import pallas as pl
from jax.experimental.pallas import tpu as pltpu

BN_EPS = 1e-5


# ---------------------------------------------------------------------------
# Fused kernel: ConvTranspose-as-GEMM -> batch stats -> BN affine -> ReLU
# ---------------------------------------------------------------------------
def _fused_generator_block_kernel(xs_ref, w_ref, gamma_ref, beta_ref, o_ref,
                                  *, n_batch, p_pad, count, eps):
    # xs_ref:    (K, N*P_pad)      bf16  im2col, batch folded into lanes
    # w_ref:     (Cout, K)         bf16  flattened equivalent-conv weight
    # gamma_ref: (Cout, 1)         f32
    # beta_ref:  (Cout, 1)         f32
    # o_ref:     (N, Cout, P_pad)  f32
    y = jnp.dot(w_ref[...], xs_ref[...],
                preferred_element_type=jnp.float32)        # (Cout, N*P_pad) f32

    # Training-mode batch statistics.  Padded lanes are exact zeros in xs, so
    # they contribute nothing to sum / sumsq; `count` = N*P (valid positions).
    inv_count = 1.0 / count
    s = jnp.sum(y, axis=1, keepdims=True)                  # (Cout, 1)
    ss = jnp.sum(y * y, axis=1, keepdims=True)             # (Cout, 1)
    mean = s * inv_count
    var = jnp.maximum(ss * inv_count - mean * mean, 0.0)   # clamp: cancellation guard
    inv_std = jax.lax.rsqrt(var + eps)

    scale = gamma_ref[...] * inv_std                       # (Cout, 1)
    shift = beta_ref[...] - mean * scale                   # (Cout, 1)

    z = jnp.maximum(y * scale + shift, 0.0)                # (Cout, N*P_pad)

    # Un-fold the batch from the lane axis: per-batch slices land on 128-lane
    # (vreg) boundaries since p_pad % 128 == 0, so these are whole-vreg stores.
    for n in range(n_batch):
        o_ref[n] = z[:, n * p_pad:(n + 1) * p_pad].astype(o_ref.dtype)


def generator_block(x_nchw, wt, gamma, beta):
    """GeneratorBlock forward: ConvTranspose2d(k,1,0,bias=False) -> BN(batch stats) -> ReLU.

    x_nchw: (N, Cin, H, W);  wt: (Cin, Cout, KH, KW)  (PyTorch ConvTranspose2d layout)
    gamma, beta: (Cout,) BatchNorm weight / bias.
    """
    N, Cin, H, W = x_nchw.shape
    Cin2, Cout, KH, KW = wt.shape
    assert Cin == Cin2

    # ConvTranspose2d(stride=1, padding=0) == Conv2d(pad(x, K-1), flip+swap(wt))
    Ho, Wo = H + KH - 1, W + KW - 1
    P = Ho * Wo
    K = KH * KW * Cin
    P_pad = ((P + 127) // 128) * 128       # lane-align per-batch positions
    L = N * P_pad                          # GEMM RHS width (batch folded into lanes)

    # Keep the whole fused working set comfortably inside VMEM (v7x: 64 MiB/TC).
    footprint = K * L * 2 + Cout * K * 2 + N * Cout * P_pad * 4 + Cout * L * 4
    assert footprint < 24 * 1024 * 1024, (
        "shapes too large for the single-step fused kernel; needs tiled variant")

    # Equivalent forward-conv weight, flattened tap-major / cin-minor: (Cout, K)
    w_conv = jnp.flip(wt, axis=(2, 3)).transpose(1, 0, 2, 3)            # (Cout, Cin, KH, KW)
    w_flat = w_conv.transpose(0, 2, 3, 1).reshape(Cout, K).astype(jnp.bfloat16)

    # im2col in bf16, taps along the contraction axis, batch folded into lanes:
    #   row index  = tap*Cin + ci      (tap-major, cin-minor, matching w_flat)
    #   lane index = n*P_pad + p
    x_bf = x_nchw.astype(jnp.bfloat16).transpose(1, 0, 2, 3)            # (Cin, N, H, W)
    xpad = jnp.pad(x_bf, ((0, 0), (0, 0), (KH - 1, KH - 1), (KW - 1, KW - 1)))
    taps = [xpad[:, :, kh:kh + Ho, kw:kw + Wo].reshape(Cin, N, P)
            for kh in range(KH) for kw in range(KW)]
    xs = jnp.concatenate(taps, axis=0)                                   # (K, N, P)
    xs = jnp.pad(xs, ((0, 0), (0, 0), (0, P_pad - P))).reshape(K, L)     # (K, N*P_pad)

    gamma2 = gamma.astype(jnp.float32).reshape(Cout, 1)
    beta2 = beta.astype(jnp.float32).reshape(Cout, 1)

    kernel = functools.partial(
        _fused_generator_block_kernel,
        n_batch=N, p_pad=P_pad, count=float(N * P), eps=BN_EPS)

    out = pl.pallas_call(
        kernel,
        out_shape=jax.ShapeDtypeStruct((N, Cout, P_pad), jnp.float32),
        grid=(1,),
        in_specs=[
            pl.BlockSpec((K, L), lambda i: (0, 0)),
            pl.BlockSpec((Cout, K), lambda i: (0, 0)),
            pl.BlockSpec((Cout, 1), lambda i: (0, 0)),
            pl.BlockSpec((Cout, 1), lambda i: (0, 0)),
        ],
        out_specs=pl.BlockSpec((N, Cout, P_pad), lambda i: (0, 0, 0)),
        compiler_params=pltpu.CompilerParams(
            dimension_semantics=("arbitrary",),
            vmem_limit_bytes=64 * 1024 * 1024,
        ),
        cost_estimate=pl.CostEstimate(
            flops=2 * Cout * K * L + 6 * Cout * L,
            transcendentals=Cout,
            bytes_accessed=K * L * 2 + Cout * K * 2
            + N * Cout * P_pad * 4 + 4 * Cout * 4,
        ),
    )(xs, w_flat, gamma2, beta2)

    # (N, Cout, P_pad) is already channel-major: drop P padding, reshape to NCHW.
    return out[:, :, :P].reshape(N, Cout, Ho, Wo)


def reference(x, wt, gamma, beta):
    """Independent scatter-form ConvTranspose2d + training-mode BN + ReLU, all f32."""
    N, Cin, H, W = x.shape
    _, Cout, KH, KW = wt.shape
    y = jnp.zeros((N, Cout, H + KH - 1, W + KW - 1), jnp.float32)
    for kh in range(KH):
        for kw in range(KW):
            contrib = jnp.einsum("nchw,co->nohw", x, wt[:, :, kh, kw])
            y = y.at[:, :, kh:kh + H, kw:kw + W].add(contrib)
    mean = y.mean(axis=(0, 2, 3), keepdims=True)
    var = ((y - mean) ** 2).mean(axis=(0, 2, 3), keepdims=True)
    yn = (y - mean) * jax.lax.rsqrt(var + BN_EPS)
    yn = yn * gamma.reshape(1, -1, 1, 1) + beta.reshape(1, -1, 1, 1)
    return jnp.maximum(yn, 0.0)


if __name__ == "__main__":
    key = jax.random.PRNGKey(0)
    k1, k2, k3, k4 = jax.random.split(key, 4)

    # GeneratorBlock(blk_id, inplanes=4, outplanes=8) defaults: k=4, stride=1, padding=0
    N, Cin, Cout, H, W = 2, 4, 8, 16, 16
    KH = KW = 4

    x = jax.random.normal(k1, (N, Cin, H, W), jnp.float32)
    wt = jax.random.normal(k2, (Cin, Cout, KH, KW), jnp.float32) * 0.1   # convTrans1.weight
    gamma = 1.0 + 0.1 * jax.random.normal(k3, (Cout,), jnp.float32)      # bn1.weight
    beta = 0.1 * jax.random.normal(k4, (Cout,), jnp.float32)             # bn1.bias

    out = jax.block_until_ready(jax.jit(generator_block)(x, wt, gamma, beta))
    ref = reference(x, wt, gamma, beta)

    assert out.shape == (N, Cout, H + KH - 1, W + KW - 1), out.shape
    np.testing.assert_allclose(np.asarray(out), np.asarray(ref), rtol=2e-2, atol=2e-2)
    print("KERNEL_OK")
</pallas_src>

<mosaic_0001>
module attributes {stable_mosaic.version = 11 : i64} {
  func.func @_fused_generator_block_kernel(%arg0: i32, %arg1: memref<64x768xbf16, #tpu.memory_space<vmem>>, %arg2: memref<8x64xbf16, #tpu.memory_space<vmem>>, %arg3: memref<8x1xf32, #tpu.memory_space<vmem>>, %arg4: memref<8x1xf32, #tpu.memory_space<vmem>>, %arg5: memref<2x8x384xf32, #tpu.memory_space<vmem>>) attributes {dimension_semantics = [#tpu.dimension_semantics<arbitrary>], iteration_bounds = array<i64: 1>, scalar_prefetch = 0 : i64, scratch_operands = 0 : i64, tpu.core_type = #tpu.core_type<tc>, window_params = [{pipeline_mode = #tpu.pipeline_mode<synchronous>, transform_indices = @transform_0, window_bounds = array<i64: 64, 768>}, {pipeline_mode = #tpu.pipeline_mode<synchronous>, transform_indices = @transform_1, window_bounds = array<i64: 8, 64>}, {pipeline_mode = #tpu.pipeline_mode<synchronous>, transform_indices = @transform_2, window_bounds = array<i64: 8, 1>}, {pipeline_mode = #tpu.pipeline_mode<synchronous>, transform_indices = @transform_3, window_bounds = array<i64: 8, 1>}, {pipeline_mode = #tpu.pipeline_mode<synchronous>, transform_indices = @transform_4, window_bounds = array<i64: 2, 8, 384>}]} {
    %c0 = arith.constant 0 : index
    %c0_0 = arith.constant 0 : index
    %0 = vector.load %arg2[%c0, %c0_0] : memref<8x64xbf16, #tpu.memory_space<vmem>>, vector<8x64xbf16>
    %c0_1 = arith.constant 0 : index
    %c0_2 = arith.constant 0 : index
    %1 = vector.load %arg1[%c0_1, %c0_2] : memref<64x768xbf16, #tpu.memory_space<vmem>>, vector<64x768xbf16>
    %cst = arith.constant dense<0.000000e+00> : vector<8x768xf32>
    %2 = tpu.matmul %0, %1, %cst {dimension_numbers = #tpu.dot_dimension_numbers<[1], [0], [0], [1], [0, 0, 1, 1], [], []>} : vector<8x64xbf16>, vector<64x768xbf16>, vector<8x768xf32> -> vector<8x768xf32>
    %cst_3 = arith.constant dense<0.000000e+00> : vector<8xf32>
    %3 = vector.multi_reduction <add>, %2, %cst_3 [1] : vector<8x768xf32> to vector<8xf32>
    %4 = vector.shape_cast %3 : vector<8xf32> to vector<8x1xf32>
    %5 = arith.mulf %2, %2 : vector<8x768xf32>
    %cst_4 = arith.constant dense<0.000000e+00> : vector<8xf32>
    %6 = vector.multi_reduction <add>, %5, %cst_4 [1] : vector<8x768xf32> to vector<8xf32>
    %7 = vector.shape_cast %6 : vector<8xf32> to vector<8x1xf32>
    %cst_5 = arith.constant 0.00138504151 : f32
    %8 = vector.broadcast %cst_5 : f32 to vector<8x1xf32>
    %9 = arith.mulf %4, %8 : vector<8x1xf32>
    %cst_6 = arith.constant 0.00138504151 : f32
    %10 = vector.broadcast %cst_6 : f32 to vector<8x1xf32>
    %11 = arith.mulf %7, %10 : vector<8x1xf32>
    %12 = arith.mulf %9, %9 : vector<8x1xf32>
    %13 = arith.subf %11, %12 : vector<8x1xf32>
    %cst_7 = arith.constant 0.000000e+00 : f32
    %14 = vector.broadcast %cst_7 : f32 to vector<8x1xf32>
    %15 = arith.maximumf %13, %14 : vector<8x1xf32>
    %cst_8 = arith.constant 9.99999974E-6 : f32
    %16 = vector.broadcast %cst_8 : f32 to vector<8x1xf32>
    %17 = arith.addf %15, %16 : vector<8x1xf32>
    %18 = math.rsqrt %17 : vector<8x1xf32>
    %c0_9 = arith.constant 0 : index
    %c0_10 = arith.constant 0 : index
    %19 = vector.load %arg3[%c0_9, %c0_10] : memref<8x1xf32, #tpu.memory_space<vmem>>, vector<8x1xf32>
    %20 = arith.mulf %19, %18 : vector<8x1xf32>
    %c0_11 = arith.constant 0 : index
    %c0_12 = arith.constant 0 : index
    %21 = vector.load %arg4[%c0_11, %c0_12] : memref<8x1xf32, #tpu.memory_space<vmem>>, vector<8x1xf32>
    %22 = arith.mulf %9, %20 : vector<8x1xf32>
    %23 = arith.subf %21, %22 : vector<8x1xf32>
    %24 = vector.broadcast %20 : vector<8x1xf32> to vector<8x768xf32>
    %25 = arith.mulf %2, %24 : vector<8x768xf32>
    %26 = vector.broadcast %23 : vector<8x1xf32> to vector<8x768xf32>
    %27 = arith.addf %25, %26 : vector<8x768xf32>
    %cst_13 = arith.constant 0.000000e+00 : f32
    %28 = vector.broadcast %cst_13 : f32 to vector<8x768xf32>
    %29 = arith.maximumf %27, %28 : vector<8x768xf32>
    %30 = vector.extract_strided_slice %29 {offsets = [0, 0], sizes = [8, 384], strides = [1, 1]} : vector<8x768xf32> to vector<8x384xf32>
    %c0_14 = arith.constant 0 : index
    %c0_15 = arith.constant 0 : index
    %c0_16 = arith.constant 0 : index
    %31 = vector.load %arg5[%c0_14, %c0_15, %c0_16] : memref<2x8x384xf32, #tpu.memory_space<vmem>>, vector<1x8x384xf32>
    %32 = vector.shape_cast %31 : vector<1x8x384xf32> to vector<8x384xf32>
    %33 = vector.shape_cast %30 : vector<8x384xf32> to vector<1x8x384xf32>
    tpu.vector_store %arg5[%c0_14, %c0_15, %c0_16], %33 {strides = array<i32>} : memref<2x8x384xf32, #tpu.memory_space<vmem>>, vector<1x8x384xf32>,
    %34 = vector.extract_strided_slice %29 {offsets = [0, 384], sizes = [8, 384], strides = [1, 1]} : vector<8x768xf32> to vector<8x384xf32>
    %c1 = arith.constant 1 : index
    %c0_17 = arith.constant 0 : index
    %c0_18 = arith.constant 0 : index
    %35 = vector.load %arg5[%c1, %c0_17, %c0_18] : memref<2x8x384xf32, #tpu.memory_space<vmem>>, vector<1x8x384xf32>
    %36 = vector.shape_cast %35 : vector<1x8x384xf32> to vector<8x384xf32>
    %37 = vector.shape_cast %34 : vector<8x384xf32> to vector<1x8x384xf32>
    tpu.vector_store %arg5[%c1, %c0_17, %c0_18], %37 {strides = array<i32>} : memref<2x8x384xf32, #tpu.memory_space<vmem>>, vector<1x8x384xf32>,
    return
  }
  func.func @transform_0(%arg0: i32) -> (i32, i32) {
    %c0_i32 = arith.constant 0 : i32
    %c0_i32_0 = arith.constant 0 : i32
    %c0_i32_1 = arith.constant 0 : i32
    return %c0_i32, %c0_i32_0 : i32, i32
  }
  func.func @transform_1(%arg0: i32) -> (i32, i32) {
    %c0_i32 = arith.constant 0 : i32
    %c0_i32_0 = arith.constant 0 : i32
    %c0_i32_1 = arith.constant 0 : i32
    return %c0_i32, %c0_i32_0 : i32, i32
  }
  func.func @transform_2(%arg0: i32) -> (i32, i32) {
    %c0_i32 = arith.constant 0 : i32
    %c0_i32_0 = arith.constant 0 : i32
    %c0_i32_1 = arith.constant 0 : i32
    return %c0_i32, %c0_i32_0 : i32, i32
  }
  func.func @transform_3(%arg0: i32) -> (i32, i32) {
    %c0_i32 = arith.constant 0 : i32
    %c0_i32_0 = arith.constant 0 : i32
    %c0_i32_1 = arith.constant 0 : i32
    return %c0_i32, %c0_i32_0 : i32, i32
  }
  func.func @transform_4(%arg0: i32) -> (i32, i32, i32) {
    %c0_i32 = arith.constant 0 : i32
    %c0_i32_0 = arith.constant 0 : i32
    %c0_i32_1 = arith.constant 0 : i32
    %c0_i32_2 = arith.constant 0 : i32
    return %c0_i32, %c0_i32_0, %c0_i32_1 : i32, i32, i32
  }
}

</mosaic_0001>

<bundles_post_ra>
// kernel: generator_block.1
= control target key start
LH: loop header
LB: loop body
LE: loop exit
PB: predicated region body
PF: predicated region fallthrough
CT: control target
= control target key end

     0   :  { %v432_v1 = vmov 0   ;;  %vm163_vm0 = vcmask 523264   ;;  %s560_s0 = inlined_call_operand.vmem [shape: bf16[64,768], index: 0, kind: input, shape index: {}]   ;;  %s561_s1 = inlined_call_operand.vmem [shape: bf16[8,64], index: 1, kind: input, shape index: {}]   ;;  %s562_s2 = inlined_call_operand.vmem [shape: f32[8,1], index: 2, kind: input, shape index: {}]   ;;  %s563_s3 = inlined_call_operand.vmem [shape: f32[8,1], index: 3, kind: input, shape index: {}]   ;;  %s564_s4 = inlined_call_operand.vmem [shape: f32[2,8,384], index: 4, kind: output, shape index: {}]  }
   0x1   :  { %v394_v0 = vld [vmem:[%s560_s0 + $0x94] ss:$24 sps:$4 sm:$0xff]   ;;  %199 = vmatprep.mubr.bf16.mxu0 %v432_v1  ;;  %240 = vmatprep.mubr.bf16.mxu1 %v432_v1  ;;  %v396_v2 = vld [vmem:[%s560_s0 + $0x90] ss:$24 sps:$4 sm:$0xff]   ;;  %v397_v3 = vld [vmem:[%s560_s0 + $0x64] ss:$24 sps:$4 sm:$0xff]  }
   0x2   :  { %392 = vset.pattern.permute.xlu1 %v432_v1  ;;  %393 = vset.pattern.permute.xlu0 %v432_v1  ;;  %v399_v4 = vld [vmem:[%s560_s0 + $0x9c] ss:$24 sps:$4 sm:$0xff]   ;;  %v401_v5 = vld [vmem:[%s560_s0 + $0x60] ss:$24 sps:$4 sm:$0xff]   ;;  %v405_v8 = vld [vmem:[%s560_s0 + $0x6c] ss:$24 sps:$4 sm:$0xff]  }
   0x3   :  { %175 = vmatprep.subr.bf16.mxu0 %v394_v0  ;;  %v402_v6 = vld [vmem:[%s560_s0 + $0x98] ss:$24 sps:$4 sm:$0xff]   ;;  %v403_v7 = vld [vmem:[%s560_s0 + $0x34] ss:$24 sps:$4 sm:$0xff]   ;;  %216 = vmatprep.subr.bf16.mxu1 %v399_v4  ;;  %v408_v9 = vld [vmem:[%s560_s0 + $0x68] ss:$24 sps:$4 sm:$0xff]  }
   0x4   :  { %176 = vmatpush1.bf16.msra.mxu0 %v396_v2  ;;  %217 = vmatpush1.bf16.msra.mxu1 %v402_v6  ;;  %v407_v10 = vld [vmem:[%s560_s0 + $0x30] ss:$24 sps:$4 sm:$0xff]   ;;  %v409_v11 = vld [vmem:[%s560_s0 + $0x4] ss:$24 sps:$4 sm:$0xff]   ;;  %v413_v14 = vld [vmem:[%s560_s0] ss:$24 sps:$4 sm:$0xff]  }
   0x5   :  { %177 = vmatprep.subr.bf16.mxu0 %v397_v3  ;;  %218 = vmatprep.subr.bf16.mxu1 %v405_v8  ;;  %v411_v12 = vld [vmem:[%s560_s0 + $0x3c] ss:$24 sps:$4 sm:$0xff]   ;;  %v414_v13 = vld [vmem:[%s560_s0 + $0x38] ss:$24 sps:$4 sm:$0xff]   ;;  %v415_v15 = vld [vmem:[%s560_s0 + $0xc] ss:$24 sps:$4 sm:$0xff]  }
   0x6   :  { %v419_v16 = vld [vmem:[%s560_s0 + $0xa4] ss:$24 sps:$4 sm:$0xff]   ;;  %v18_v17 = vld [vmem:[%s561_s1] sm:$0xf]  ;;  %v423_v20 = vld [vmem:[%s560_s0 + $0x74] ss:$24 sps:$4 sm:$0xff]  }
   0x7   :  { %v420_v18 = vld [vmem:[%s560_s0 + $0x8] ss:$24 sps:$4 sm:$0xff]   ;;  %v426_v22 = vld [vmem:[%s560_s0 + $0x44] ss:$24 sps:$4 sm:$0xff]   ;;  %v429_v24 = vld [vmem:[%s560_s0 + $0x14] ss:$24 sps:$4 sm:$0xff]  }
   0x8   :  { %178 = vmatpush1.bf16.msra.mxu0 %v401_v5  ;;  %219 = vmatpush1.bf16.msra.mxu1 %v408_v9  ;;  %v417_v19 = vld [vmem:[%s560_s0 + $0xa0] ss:$24 sps:$4 sm:$0xff]   ;;  %v421_v21 = vld [vmem:[%s560_s0 + $0x70] ss:$24 sps:$4 sm:$0xff]  }
   0x9   :  { %179 = vmatprep.subr.bf16.mxu0 %v403_v7  ;;  %220 = vmatprep.subr.bf16.mxu1 %v411_v12  ;;  %v424_v23 = vld [vmem:[%s560_s0 + $0x40] ss:$24 sps:$4 sm:$0xff]   ;;  %v427_v25 = vld [vmem:[%s560_s0 + $0x10] ss:$24 sps:$4 sm:$0xff]  }
   0xa   :  { %v317_v62 = vld [vmem:[%s562_s2] sm:$0xff] }
   0xc   :  { %180 = vmatpush1.bf16.msra.mxu0 %v407_v10  ;;  %221 = vmatpush1.bf16.msra.mxu1 %v414_v13 }
   0xd   :  { %181 = vmatprep.subr.bf16.mxu0 %v409_v11  ;;  %222 = vmatprep.subr.bf16.mxu1 %v415_v15 }
  0x10   :  { %182 = vmatpush1.bf16.msra.mxu0 %v413_v14  ;;  %223 = vmatpush1.bf16.msra.mxu1 %v420_v18 }
  0x11   :  { %257 = vmatprep.subr.bf16.mxu0 %v419_v16 }
  0x13   :  { %385 = vmatmul.mubr.msk.bf16.vlgmr.msra.gmra.mxu0 %vm163_vm0, %v18_v17  ;;  %386 = vmatmul.mubr.msk.bf16.vlgmr.msra.gmra.mxu1 %vm163_vm0, %v18_v17 }
  0x14   :  { %258 = vmatpush1.bf16.msra.mxu0 %v417_v19  ;;  %281 = vmatprep.mubr.bf16.mxu0 %v432_v1  ;;  %v319_v1 = vld [vmem:[%s563_s3] sm:$0xff] }
  0x15   :  { %259 = vmatprep.subr.bf16.mxu0 %v423_v20 }
  0x18   :  { %260 = vmatpush1.bf16.msra.mxu0 %v421_v21 }
  0x19   :  { %261 = vmatprep.subr.bf16.mxu0 %v426_v22 }
  0x1c   :  { %262 = vmatpush1.bf16.msra.mxu0 %v424_v23 }
  0x1d   :  { %263 = vmatprep.subr.bf16.mxu0 %v429_v24 }
  0x20   :  { %264 = vmatpush1.bf16.msra.mxu0 %v427_v25 }
  0x23   :  { %387 = vmatmul.mubr.msk.bf16.vlgmr.msra.gmra.mxu0 %vm163_vm0, %v18_v17 }
  0xd3   :  { %v201_v26 = vpop.f32.mrf.mxu0  ;;  %v242_v28 = vpop.f32.mrf.mxu1 }
  0xd4   :  { %v297_v30 = vmul.f32 %v201_v26, %v201_v26  ;;  %v299_v37 = vmul.f32 %v242_v28, %v242_v28 }
  0xd5   :  { %v203_v27 = vpop.f32.mrf.mxu0  ;;  %v244_v32 = vpop.f32.mrf.mxu1 }
  0xd6   :  { %v298_v31 = vmul.f32 %v203_v27, %v203_v27  ;;  %v290_v34 = vadd.f32 %v203_v27, %v201_v26  ;;  %v300_v41 = vmul.f32 %v244_v32, %v244_v32 }
  0xd7   :  { %v205_v29 = vpop.f32.mrf.mxu0  ;;  %v246_v35 = vpop.f32.mrf.mxu1 }
  0xd8   :  { %v303_v36 = vadd.f32 %v298_v31, %v297_v30  ;;  %v291_v39 = vadd.f32 %v290_v34, %v242_v28 }
  0xd9   :  { %v206_v33 = vpop.f32.mrf.mxu0  ;;  %v247_v38 = vpop.f32.mrf.mxu1 }
  0xda   :  { %v304_v40 = vadd.f32 %v303_v36, %v299_v37  ;;  %v292_v42 = vadd.f32 %v291_v39, %v244_v32 }
  0xdc   :  { %v305_v46 = vadd.f32 %v304_v40, %v300_v41 }
  0xe3   :  { %v283_v43 = vpop.f32.mrf.mxu0 }
  0xe4   :  { %v301_v44 = vmul.f32 %v283_v43, %v283_v43  ;;  %v293_v45 = vadd.f32 %v292_v42, %v283_v43 }
  0xe5   :  { %v285_v47 = vpop.f32.mrf.mxu0 }
  0xe6   :  { %v294_v48 = vadd.f32 %v293_v45, %v285_v47  ;;  %v302_v49 = vmul.f32 %v285_v47, %v285_v47  ;;  %v306_v50 = vadd.f32 %v305_v46, %v301_v44 }
  0xe7   :  { %v287_v51 = vpop.f32.mrf.mxu0 }
  0xe8   :  { %295 = vadd.xlane.f32.xlu0 %v294_v48  ;;  %v307_v53 = vadd.f32 %v306_v50, %v302_v49 }
  0xe9   :  { %v288_v52 = vpop.f32.mrf.mxu0 }
  0xec   :  { %308 = vadd.xlane.f32.xlu0 %v307_v53 }
 0x171   :  { %v296_v54 = vpop.xlane.xlu0 %295 }
 0x172   :  { %v310_v55 = vmul.f32 0.0013850415, %v296_v54 }
 0x174   :  { %v312_v57 = vmul.f32 %v310_v55, %v310_v55 }
 0x175   :  { %v309_v56 = vpop.xlane.xlu0 %308 }
 0x176   :  { %v311_v58 = vmul.f32 0.0013850415, %v309_v56 }
 0x178   :  { %v313_v59 = vsub.f32 %v311_v58, %v312_v57 }
 0x17a   :  { %v314_v60 = vmax.f32 %v313_v59, 0.0 }
 0x17c   :  { %v315_v61 = vadd.f32 1e-05, %v314_v60 }
 0x17e   :  { %430 = vrsqrt.f32 %v315_v61 }
 0x18b   :  { %v431_v63 = vpop.eup %430 }
 0x18c   :  { %v318_v0 = vmul.f32 %v431_v63, %v317_v62 }
 0x18e   :  { %324 = vperm.xlu1 %392, %v318_v0   ;;  %v320_v2 = vmul.f32 %v318_v0, %v310_v55 }
 0x190   :  { %v321_v3 = vsub.f32 %v319_v1, %v320_v2 }
 0x192   :  { %335 = vperm.xlu1 %392, %v321_v3  }
 0x209   :  { %v325_v4 = vpop.permute.xlu1 %324 }
 0x20a   :  { %v327_v5 = vmul.f32 %v325_v4, %v201_v26  ;;  %v328_v6 = vmul.f32 %v325_v4, %v203_v27  ;;  %v329_v7 = vmul.f32 %v325_v4, %v242_v28  ;;  %v330_v8 = vmul.f32 %v325_v4, %v244_v32 }
 0x20b   :  { %v331_v9 = vmul.f32 %v325_v4, %v283_v43  ;;  %v332_v10 = vmul.f32 %v325_v4, %v285_v47 }
 0x20d   :  { %v336_v11 = vpop.permute.xlu1 %335 }
 0x20e   :  { %v338_v12 = vadd.f32 %v336_v11, %v327_v5  ;;  %v339_v13 = vadd.f32 %v336_v11, %v328_v6  ;;  %v340_v14 = vadd.f32 %v336_v11, %v329_v7  ;;  %v341_v15 = vadd.f32 %v336_v11, %v330_v8 }
 0x20f   :  { %v342_v16 = vadd.f32 %v336_v11, %v331_v9  ;;  %v343_v17 = vadd.f32 %v336_v11, %v332_v10 }
 0x210   :  { %v344_v18 = vmax.f32 %v338_v12, 0.0  ;;  %v345_v19 = vmax.f32 %v339_v13, 0.0  ;;  %v346_v20 = vmax.f32 %v340_v14, 0.0  ;;  %v347_v21 = vmax.f32 %v341_v15, 0.0 }
 0x211   :  { %v348_v22 = vmax.f32 %v342_v16, 0.0  ;;  %v349_v23 = vmax.f32 %v343_v17, 0.0 }
 0x212   :  { %350 = vst [vmem:[%s564_s4] sm:$0xff] %v344_v18  ;;  %351 = vst [vmem:[%s564_s4 + $0x8] sm:$0xff] %v345_v19 }
 0x213   :  { %352 = vst [vmem:[%s564_s4 + $0x10] sm:$0xff] %v346_v20  ;;  %388 = vst [vmem:[%s564_s4 + $0x18] sm:$0xff] %v347_v21 }
 0x214   :  { %389 = vst [vmem:[%s564_s4 + $0x20] sm:$0xff] %v348_v22  ;;  %390 = vst [vmem:[%s564_s4 + $0x28] sm:$0xff] %v349_v23 }

</bundles_post_ra>
